<compile_context>
chip_gen: v5e
topology: v5e:2x2
jax: 0.10.0
libtpu: 0.0.40
codegen_flags: <defaults>
</compile_context>

<pallas_src>
import functools

import jax
import jax.numpy as jnp
from jax.experimental import pallas as pl
from jax.experimental.pallas import tpu as pltpu

_HIGHEST = jax.lax.Precision.HIGHEST


def _chip_profile():
    """Returns (vmem_capacity, target_block_bytes, vmem_limit_bytes)."""
    cap = 64 * 1024 * 1024  # conservative default (v7x per-TC VMEM)
    try:
        cap = int(getattr(pltpu.get_tpu_info(), "vmem_capacity_bytes", cap))
    except Exception:
        pass
    kind = ""
    try:
        kind = jax.devices()[0].device_kind.lower()
    except Exception:
        pass
    if cap <= 64 * 1024 * 1024:
        # v7x: 64 MiB VMEM, ~3.2 TB/s HBM -> large tiles to amortize the
        # ~0.35us per-grid-step overhead; leave headroom under physical VMEM.
        return cap, 7 * 1024 * 1024, 48 * 1024 * 1024
    if "v5" in kind:
        # v5e: ~820 GB/s HBM, step overhead already <10% at 2-4 MiB tiles.
        return cap, 3 * 1024 * 1024, 32 * 1024 * 1024
    # v6e: 128 MiB VMEM, ~1.3 TB/s HBM.
    return cap, 5 * 1024 * 1024, 64 * 1024 * 1024


def _choose_hw_tile(hw, c, target_block_bytes):
    """Lane-dense (multiple-of-128) spatial tile; the array itself is NOT padded."""
    lanes = max(128, (target_block_bytes // (4 * max(c, 1))) // 128 * 128)
    hw128 = pl.cdiv(hw, 128) * 128
    return min(lanes, hw128)


# ----------------------------- kernels ------------------------------------


def _fused_kernel(x_ref, w1_ref, b1_ref, w2_ref, b2_ref, o_ref, *, inv_hw):
    """One batch slab resident in VMEM: pool -> MLP -> scale in a single body."""
    x = x_ref[0]                                                # (C, HW)
    pooled = jnp.sum(x.astype(jnp.float32), axis=-1, keepdims=True) * inv_hw
    y1 = jnp.dot(w1_ref[...], pooled, precision=_HIGHEST,
                 preferred_element_type=jnp.float32) + b1_ref[...]
    y1 = jnp.maximum(y1, 0.0)
    y2 = jnp.dot(w2_ref[...], y1, precision=_HIGHEST,
                 preferred_element_type=jnp.float32) + b2_ref[...]
    scale = jax.nn.sigmoid(y2)                                  # (C, 1)
    o_ref[0] = (x * scale).astype(o_ref.dtype)                  # (C,HW)*(C,1)


def _pool_mlp_kernel(x_ref, w1_ref, b1_ref, w2_ref, b2_ref, s_ref, acc_ref,
                     *, hw, t_hw, inv_hw):
    """Per-channel spatial sums; SE-MLP folded into the last reduction step."""
    t = pl.program_id(1)

    @pl.when(t == 0)
    def _():
        acc_ref[...] = jnp.zeros_like(acc_ref)

    x = x_ref[0].astype(jnp.float32)                            # (C, t_hw)
    if hw % t_hw != 0:
        # Ragged last tile: OOB lanes hold unspecified data -> mask them out.
        lane = jax.lax.broadcasted_iota(jnp.int32, x.shape, 1)
        x = jnp.where(t * t_hw + lane < hw, x, 0.0)
    # Spatial reduction on VPU/XLU (exact f32); leaves the DMA path as the
    # only bottleneck and avoids HIGHEST-precision MXU emulation.
    acc_ref[...] += jnp.sum(x, axis=-1, keepdims=True)          # (C, 1)

    @pl.when(t == pl.num_programs(1) - 1)
    def _():
        pooled = acc_ref[...] * inv_hw                          # (C, 1)
        y1 = jnp.dot(w1_ref[...], pooled, precision=_HIGHEST,
                     preferred_element_type=jnp.float32) + b1_ref[...]
        y1 = jnp.maximum(y1, 0.0)
        y2 = jnp.dot(w2_ref[...], y1, precision=_HIGHEST,
                     preferred_element_type=jnp.float32) + b2_ref[...]
        s_ref[0] = jax.nn.sigmoid(y2)                           # (C, 1)


def _scale_kernel(x_ref, s_ref, o_ref):
    """Streaming channel-wise rescale: out = x * scale (broadcast over HW)."""
    o_ref[0] = (x_ref[0] * s_ref[0]).astype(o_ref.dtype)        # (C,T)*(C,1)


# ----------------------------- wrapper -------------------------------------


def ca_layer(x, w1, b1, w2, b2, *, force_tiled=False, hw_tile=None):
    """x: (N,C,H,W) f32.  w1: (C//8,C), b1: (C//8,1), w2: (C,C//8), b2: (C,1)."""
    N, C, H, W = x.shape
    C8 = w1.shape[0]
    HW = H * W
    inv_hw = 1.0 / float(HW)

    x_flat = x.reshape(N, C, HW)                 # contiguous reshape: bitcast
    cap, target_block_bytes, vmem_limit = _chip_profile()
    slab_bytes = C * HW * x.dtype.itemsize

    w_specs = [
        pl.BlockSpec((C8, C), lambda *_: (0, 0)),
        pl.BlockSpec((C8, 1), lambda *_: (0, 0)),
        pl.BlockSpec((C, C8), lambda *_: (0, 0)),
        pl.BlockSpec((C, 1), lambda *_: (0, 0)),
    ]

    # ---- Fast path: fused single-read / single-write per batch slab -------
    if not force_tiled and slab_bytes <= cap // 6:
        out_flat = pl.pallas_call(
            functools.partial(_fused_kernel, inv_hw=inv_hw),
            out_shape=jax.ShapeDtypeStruct((N, C, HW), x.dtype),
            grid_spec=pltpu.PrefetchScalarGridSpec(
                num_scalar_prefetch=0,
                grid=(N,),
                in_specs=[pl.BlockSpec((1, C, HW), lambda n: (n, 0, 0))]
                + w_specs,
                out_specs=pl.BlockSpec((1, C, HW), lambda n: (n, 0, 0)),
            ),
            input_output_aliases={0: 0},
            compiler_params=pltpu.CompilerParams(
                dimension_semantics=("parallel",),
                vmem_limit_bytes=int(cap * 3 // 4)),
        )(x_flat, w1, b1, w2, b2)
        return out_flat.reshape(N, C, H, W)

    # ---- Tiled fallback ----------------------------------------------------
    t_hw = hw_tile or _choose_hw_tile(HW, C, target_block_bytes)
    num_t = pl.cdiv(HW, t_hw)

    # Pass 1: spatial sums accumulated per batch; the SE-MLP runs on the final
    # reduction step and emits the per-batch (C, 1) scales directly.
    scales = pl.pallas_call(
        functools.partial(_pool_mlp_kernel, hw=HW, t_hw=t_hw, inv_hw=inv_hw),
        out_shape=jax.ShapeDtypeStruct((N, C, 1), jnp.float32),
        grid_spec=pltpu.PrefetchScalarGridSpec(
            num_scalar_prefetch=0,
            grid=(N, num_t),
            in_specs=[pl.BlockSpec((1, C, t_hw), lambda n, t: (n, 0, t))]
            + w_specs,
            out_specs=pl.BlockSpec((1, C, 1), lambda n, t: (n, 0, 0)),
            scratch_shapes=[pltpu.VMEM((C, 1), jnp.float32)],
        ),
        compiler_params=pltpu.CompilerParams(
            dimension_semantics=("parallel", "arbitrary"),
            vmem_limit_bytes=vmem_limit),
    )(x_flat, w1, b1, w2, b2)

    # Pass 2: streaming rescale, both axes parallel (megacore), lane-dense
    # tiles, result aliased onto x's buffer (copy-free when the caller
    # donates x; the reshape above is a bitcast, never a padded copy).
    out_flat = pl.pallas_call(
        _scale_kernel,
        out_shape=jax.ShapeDtypeStruct((N, C, HW), x.dtype),
        grid_spec=pltpu.PrefetchScalarGridSpec(
            num_scalar_prefetch=0,
            grid=(N, num_t),
            in_specs=[
                pl.BlockSpec((1, C, t_hw), lambda n, t: (n, 0, t)),
                pl.BlockSpec((1, C, 1), lambda n, t: (n, 0, 0)),
            ],
            out_specs=pl.BlockSpec((1, C, t_hw), lambda n, t: (n, 0, t)),
        ),
        input_output_aliases={0: 0},
        compiler_params=pltpu.CompilerParams(
            dimension_semantics=("parallel", "parallel"),
            vmem_limit_bytes=vmem_limit),
    )(x_flat, scales)

    return out_flat.reshape(N, C, H, W)


def ca_layer_ref(x, w1, b1, w2, b2):
    """Pure-JAX reference matching the PyTorch forward."""
    pooled = jnp.mean(x, axis=(2, 3), keepdims=True)            # (N, C, 1, 1)
    y = jnp.einsum("oc,ncij->noij", w1, pooled,
                   precision=_HIGHEST) + b1[None, :, :, None]
    y = jnp.maximum(y, 0.0)
    y = jnp.einsum("oc,ncij->noij", w2, y,
                   precision=_HIGHEST) + b2[None, :, :, None]
    return x * jax.nn.sigmoid(y)


if __name__ == "__main__":
    # Small shapes consistent with the module: channel divisible by 8.
    N, C, H, W = 2, 16, 16, 16
    C8 = C // 8

    key = jax.random.PRNGKey(0)
    kx, k1, k2, k3, k4 = jax.random.split(key, 5)

    x = jax.random.normal(kx, (N, C, H, W), dtype=jnp.float32)
    # Conv2d(channel, channel//8, 1) weight: (C//8, C, 1, 1) -> (C//8, C)
    w1 = jax.random.normal(k1, (C8, C), dtype=jnp.float32) * 0.1
    b1 = jax.random.normal(k2, (C8, 1), dtype=jnp.float32) * 0.1
    # Conv2d(channel//8, channel, 1) weight: (C, C//8, 1, 1) -> (C, C//8)
    w2 = jax.random.normal(k3, (C, C8), dtype=jnp.float32) * 0.1
    b2 = jax.random.normal(k4, (C, 1), dtype=jnp.float32) * 0.1

    # Fused fast path (the per-batch slab trivially fits VMEM here).
    out = jax.block_until_ready(jax.jit(ca_layer)(x, w1, b1, w2, b2))
    ref = jax.block_until_ready(ca_layer_ref(x, w1, b1, w2, b2))
    assert out.shape == x.shape
    assert jnp.allclose(out, ref, atol=1e-5, rtol=1e-5), "fused path mismatch"

    # Tiled fallback path, exercising the in-kernel ragged-tail mask
    # (HW = 320 with a 128-lane tile -> 64 valid lanes in the last block).
    H2, W2 = 16, 20
    x2 = jax.random.normal(kx, (N, C, H2, W2), dtype=jnp.float32)
    tiled_fn = jax.jit(
        functools.partial(ca_layer, force_tiled=True, hw_tile=128))
    out2 = jax.block_until_ready(tiled_fn(x2, w1, b1, w2, b2))
    ref2 = jax.block_until_ready(ca_layer_ref(x2, w1, b1, w2, b2))
    assert out2.shape == x2.shape
    assert jnp.allclose(out2, ref2, atol=1e-5, rtol=1e-5), "tiled path mismatch"

    print("KERNEL_OK")
</pallas_src>

<mosaic_0001>
module attributes {stable_mosaic.version = 11 : i64} {
  func.func @_fused_kernel(%arg0: i32, %arg1: memref<1x16x256xf32, #tpu.memory_space<vmem>>, %arg2: memref<2x16xf32, #tpu.memory_space<vmem>>, %arg3: memref<2x1xf32, #tpu.memory_space<vmem>>, %arg4: memref<16x2xf32, #tpu.memory_space<vmem>>, %arg5: memref<16x1xf32, #tpu.memory_space<vmem>>, %arg6: memref<1x16x256xf32, #tpu.memory_space<vmem>>) attributes {dimension_semantics = [#tpu.dimension_semantics<parallel>], iteration_bounds = array<i64: 2>, scalar_prefetch = 0 : i64, scratch_operands = 0 : i64, tpu.core_type = #tpu.core_type<tc>, window_params = [{transform_indices = @transform_0, window_bounds = array<i64: 1, 16, 256>}, {pipeline_mode = #tpu.pipeline_mode<synchronous>, transform_indices = @transform_1, window_bounds = array<i64: 2, 16>}, {pipeline_mode = #tpu.pipeline_mode<synchronous>, transform_indices = @transform_2, window_bounds = array<i64: 2, 1>}, {pipeline_mode = #tpu.pipeline_mode<synchronous>, transform_indices = @transform_3, window_bounds = array<i64: 16, 2>}, {pipeline_mode = #tpu.pipeline_mode<synchronous>, transform_indices = @transform_4, window_bounds = array<i64: 16, 1>}, {transform_indices = @transform_5, window_bounds = array<i64: 1, 16, 256>}]} {
    %c0 = arith.constant 0 : index
    %c0_0 = arith.constant 0 : index
    %c0_1 = arith.constant 0 : index
    %0 = vector.load %arg1[%c0, %c0_0, %c0_1] : memref<1x16x256xf32, #tpu.memory_space<vmem>>, vector<1x16x256xf32>
    %1 = vector.shape_cast %0 : vector<1x16x256xf32> to vector<16x256xf32>
    %cst = arith.constant dense<0.000000e+00> : vector<16xf32>
    %2 = vector.multi_reduction <add>, %1, %cst [1] : vector<16x256xf32> to vector<16xf32>
    %3 = vector.shape_cast %2 : vector<16xf32> to vector<16x1xf32>
    %cst_2 = arith.constant 3.906250e-03 : f32
    %4 = vector.broadcast %cst_2 : f32 to vector<16x1xf32>
    %5 = arith.mulf %3, %4 : vector<16x1xf32>
    %c0_3 = arith.constant 0 : index
    %c0_4 = arith.constant 0 : index
    %6 = vector.load %arg2[%c0_3, %c0_4] : memref<2x16xf32, #tpu.memory_space<vmem>>, vector<2x16xf32>
    %cst_5 = arith.constant dense<0.000000e+00> : vector<2x1xf32>
    %7 = tpu.matmul %6, %5, %cst_5 {dimension_numbers = #tpu.dot_dimension_numbers<[1], [0], [0], [1], [0, 0, 1, 1], [], []>, precision = #tpu.contract_precision<fp32>} : vector<2x16xf32>, vector<16x1xf32>, vector<2x1xf32> -> vector<2x1xf32>
    %c0_6 = arith.constant 0 : index
    %c0_7 = arith.constant 0 : index
    %8 = vector.load %arg3[%c0_6, %c0_7] : memref<2x1xf32, #tpu.memory_space<vmem>>, vector<2x1xf32>
    %9 = arith.addf %7, %8 : vector<2x1xf32>
    %cst_8 = arith.constant 0.000000e+00 : f32
    %10 = vector.broadcast %cst_8 : f32 to vector<2x1xf32>
    %11 = arith.maximumf %9, %10 : vector<2x1xf32>
    %c0_9 = arith.constant 0 : index
    %c0_10 = arith.constant 0 : index
    %12 = vector.load %arg4[%c0_9, %c0_10] : memref<16x2xf32, #tpu.memory_space<vmem>>, vector<16x2xf32>
    %cst_11 = arith.constant dense<0.000000e+00> : vector<16x1xf32>
    %13 = tpu.matmul %12, %11, %cst_11 {dimension_numbers = #tpu.dot_dimension_numbers<[1], [0], [0], [1], [0, 0, 1, 1], [], []>, precision = #tpu.contract_precision<fp32>} : vector<16x2xf32>, vector<2x1xf32>, vector<16x1xf32> -> vector<16x1xf32>
    %c0_12 = arith.constant 0 : index
    %c0_13 = arith.constant 0 : index
    %14 = vector.load %arg5[%c0_12, %c0_13] : memref<16x1xf32, #tpu.memory_space<vmem>>, vector<16x1xf32>
    %15 = arith.addf %13, %14 : vector<16x1xf32>
    %16 = arith.negf %15 : vector<16x1xf32>
    %17 = math.exp %16 : vector<16x1xf32>
    %cst_14 = arith.constant 1.000000e+00 : f32
    %18 = vector.broadcast %cst_14 : f32 to vector<16x1xf32>
    %19 = arith.addf %18, %17 : vector<16x1xf32>
    %20 = arith.divf %18, %19 : vector<16x1xf32>
    %21 = vector.broadcast %20 : vector<16x1xf32> to vector<16x256xf32>
    %22 = arith.mulf %1, %21 : vector<16x256xf32>
    %c0_15 = arith.constant 0 : index
    %c0_16 = arith.constant 0 : index
    %c0_17 = arith.constant 0 : index
    %23 = vector.load %arg6[%c0_15, %c0_16, %c0_17] : memref<1x16x256xf32, #tpu.memory_space<vmem>>, vector<1x16x256xf32>
    %24 = vector.shape_cast %23 : vector<1x16x256xf32> to vector<16x256xf32>
    %25 = vector.shape_cast %22 : vector<16x256xf32> to vector<1x16x256xf32>
    tpu.vector_store %arg6[%c0_15, %c0_16, %c0_17], %25 {strides = array<i32>} : memref<1x16x256xf32, #tpu.memory_space<vmem>>, vector<1x16x256xf32>,
    return
  }
  func.func @transform_0(%arg0: i32) -> (i32, i32, i32) {
    %c0_i32 = arith.constant 0 : i32
    %c0_i32_0 = arith.constant 0 : i32
    %c0_i32_1 = arith.constant 0 : i32
    return %arg0, %c0_i32, %c0_i32_0 : i32, i32, i32
  }
  func.func @transform_1(%arg0: i32) -> (i32, i32) {
    %c0_i32 = arith.constant 0 : i32
    %c0_i32_0 = arith.constant 0 : i32
    %c0_i32_1 = arith.constant 0 : i32
    return %c0_i32, %c0_i32_0 : i32, i32
  }
  func.func @transform_2(%arg0: i32) -> (i32, i32) {
    %c0_i32 = arith.constant 0 : i32
    %c0_i32_0 = arith.constant 0 : i32
    %c0_i32_1 = arith.constant 0 : i32
    return %c0_i32, %c0_i32_0 : i32, i32
  }
  func.func @transform_3(%arg0: i32) -> (i32, i32) {
    %c0_i32 = arith.constant 0 : i32
    %c0_i32_0 = arith.constant 0 : i32
    %c0_i32_1 = arith.constant 0 : i32
    return %c0_i32, %c0_i32_0 : i32, i32
  }
  func.func @transform_4(%arg0: i32) -> (i32, i32) {
    %c0_i32 = arith.constant 0 : i32
    %c0_i32_0 = arith.constant 0 : i32
    %c0_i32_1 = arith.constant 0 : i32
    return %c0_i32, %c0_i32_0 : i32, i32
  }
  func.func @transform_5(%arg0: i32) -> (i32, i32, i32) {
    %c0_i32 = arith.constant 0 : i32
    %c0_i32_0 = arith.constant 0 : i32
    %c0_i32_1 = arith.constant 0 : i32
    return %arg0, %c0_i32, %c0_i32_0 : i32, i32, i32
  }
}

</mosaic_0001>

<bundles_post_ra>
// kernel: ca_layer.1
= control target key start
LH: loop header
LB: loop body
LE: loop exit
PB: predicated region body
PF: predicated region fallthrough
CT: control target
= control target key end

     0   :  { %s779_s18 = smov 0   ;;  %s837_s0 = inlined_call_operand.vmem [shape: f32[2,16,256], index: 0, kind: input, shape index: {}, may-alias: {0,5}]   ;;  %s838_s1 = inlined_call_operand.vmem [shape: f32[2,16], index: 1, kind: input, shape index: {}]   ;;  %s839_s2 = inlined_call_operand.vmem [shape: f32[2,1], index: 2, kind: input, shape index: {}]   ;;  %s840_s3 = inlined_call_operand.vmem [shape: f32[16,2], index: 3, kind: input, shape index: {}]   ;;  %s841_s4 = inlined_call_operand.vmem [shape: f32[16,1], index: 4, kind: input, shape index: {}]   ;;  %s842_s5 = inlined_call_operand.vmem [shape: f32[2,16,256], index: 5, kind: output, shape index: {}, may-alias: {0,5}]  }
   0x1 LB: > { %s706_s19 = sadd.s32 4294967295, %s746_s18   ;;  %p710_p0 = scmp.ge.s32.totalorder %s746_s18, 1  ;;  %s746_s18 = sphi %s779_s18, %s15_s18  }
   0x2   : > { %p187_p1 = scmp.lt.s32.totalorder %s746_s18, 3 }
   0x4   : > { %p188_p2 = pnand %p710_p0, %p187_p1 }
   0x5   : > { %p215_p3 = scmp.lt.s32.totalorder (!%p188_p2), %s706_s19, 1 }
   0x6   : > { %191 = sbr.rel (%p188_p2) target bundleno = 609 (0x261), region = 40 }
   0xb   : > { %s844_s19 = smov (!%p215_p3, %s706_s19), 1  ;;  %v237_v6 = vld [vmem:[%s838_s1] sm:$0x3]  ;;  %vm239_vm0 = vcmask 130048   ;;  %vm407_vm1 = vcmask 15360   ;;  %v404_v33 = vld [vmem:[%s840_s3 + $0x8] sm:$0xff] }
   0xc   : > { %s719_s20 = sshll.u32 %s844_s19, 5  ;;  %v241_v7 = vsel %vm239_vm0, %v237_v6, 0  ;;  %v403_v27 = vld [vmem:[%s840_s3] sm:$0xff]  ;;  %v412_v39 = vsel %vm407_vm1, %v404_v33, 0  ;;  %vm414_vm2 = vcmask 1041408  }
   0xd   : > { %s219_s23 = scalar_lea.vmem %s837_s0, %s719_s20  ;;  %v261_v8 = vand.u32 4294901760, %v241_v7  ;;  %v238_v28 = vld [vmem:[%s839_s2] sm:$0x3]  ;;  %v409_v30 = vsel %vm407_vm1, %v403_v27, 0  ;;  %v443_v44 = vand.u32 4294901760, %v412_v39  ;;  %s224_s13 = scalar_lea.vmem %s842_s5, %s719_s20 }
   0xe   : > { %v795_v0 = vld [vmem:[%s219_s23 + $0x10] sm:$0xff]  ;;  %v797_v1 = vld [vmem:[%s219_s23 + $0x18] sm:$0xff]  ;;  %v801_v3 = vld [vmem:[%s219_s23] sm:$0xff]  ;;  %v435_v32 = vand.u32 4294901760, %v409_v30 }
   0xf   : > { %v232_v2 = vadd.f32 %v797_v1, %v795_v0  ;;  %v803_v4 = vld [vmem:[%s219_s23 + $0x8] sm:$0xff]  ;;  %v262_v9 = vsub.f32 %v241_v7, %v261_v8  ;;  %v444_v49 = vsub.f32 %v412_v39, %v443_v44  ;;  %v405_v62 = vld [vmem:[%s841_s4] sm:$0xff] }
  0x10   : > { %v229_v5 = vadd.f32 %v803_v4, %v801_v3  ;;  %v436_v37 = vsub.f32 %v409_v30, %v435_v32 }
  0x11   : > { %233 = vadd.xlane.f32.xlu0 %v232_v2  ;;  %v263_v13 = vand.u32 4294901760, %v262_v9  ;;  %v445_v53 = vand.u32 4294901760, %v444_v49 }
  0x12   : > { %v437_v43 = vand.u32 4294901760, %v436_v37 }
  0x13   : > { %v264_v16 = vsub.f32 %v262_v9, %v263_v13  ;;  %v446_v56 = vsub.f32 %v444_v49, %v445_v53 }
  0x14   : > { %v438_v48 = vsub.f32 %v436_v37, %v437_v43 }
  0x15   : > { %v265_v22 = vand.u32 4294901760, %v264_v16  ;;  %v447_v59 = vand.u32 4294901760, %v446_v56 }
  0x16   : > { %v439_v52 = vand.u32 4294901760, %v438_v48 }
  0x19   : > { %230 = vadd.xlane.f32.xlu0 %v229_v5 }
  0x84   : > { %v234_v10 = vpop.xlane.xlu0 %233 }
  0x85   : > { %v236_v11 = vmul.f32 0.00390625, %v234_v10 }
  0x87   : > { %v257_v12 = vand.u32 4294901760, %v236_v11 }
  0x89   : > { %v285_v14 = vsub.f32 %v236_v11, %v257_v12  ;;  %258 = vmatpush.msra.mxu0 %v257_v12  ;;  %342 = vmatpush.msra.mxu3 %v257_v12 }
  0x8b   : > { %317 = vmatpush.msra.mxu2 %v285_v14  ;;  %v286_v15 = vand.u32 4294901760, %v285_v14 }
  0x8c   : > { %v231_v17 = vpop.xlane.xlu0 %230 }
  0x8d   : > { %v235_v18 = vmul.f32 0.00390625, %v231_v17  ;;  %v287_v19 = vsub.f32 %v285_v14, %v286_v15 }
  0x8f   : > { %v259_v20 = vand.u32 4294901760, %v235_v18  ;;  %v288_v21 = vand.u32 4294901760, %v287_v19 }
  0x91   : > { %v291_v23 = vsub.f32 %v235_v18, %v259_v20  ;;  %260 = vmatpush.msra.mxu0 %v259_v20  ;;  %289 = vmatpush.msra.mxu1 %v288_v21 }
  0x92   : > { %344 = vmatpush.msra.mxu3 %v259_v20  ;;  %266 = vmatmul.f32.vlgmr.msra.gmra.mxu0 %v265_v22 }
  0x93   : > { %369 = vmatpush.msrb.mxu0 %v286_v15  ;;  %320 = vmatpush.msra.mxu2 %v291_v23  ;;  %v292_v24 = vand.u32 4294901760, %v291_v23 }
  0x94   : > { %323 = vmatmul.f32.vlgmr.msra.gmra.mxu2 %v262_v9  ;;  %348 = vmatmul.f32.vlgmr.msra.gmra.mxu3 %v263_v13  ;;  %v748_v9 = vmov 0  }
  0x95   : > { %373 = vmatpush.msrb.mxu0 %v292_v24  ;;  %v293_v25 = vsub.f32 %v291_v23, %v292_v24  ;;  %730 = vset.pattern.permute.xlu1 %v748_v9 }
  0x96   : > { %731 = vset.pattern.permute.xlu0 %v748_v9 }
  0x97   : > { %v294_v26 = vand.u32 4294901760, %v293_v25 }
  0x99   : > { %295 = vmatpush.msra.mxu1 %v294_v26 }
  0x9a   : > { %297 = vmatmul.f32.vlgmr.msra.gmra.mxu1 %v261_v8  ;;  %375 = vmatmul.f32.vlgmr.msrb.gmra.mxu0 %v261_v8 }
  0x9b   : > { %394 = vmatpush.msrb.mxu1 %v257_v12 }
  0x9d   : > { %396 = vmatpush.msrb.mxu1 %v259_v20 }
  0xa2   : > { %398 = vmatmul.f32.vlgmr.msrb.gmra.mxu1 %v261_v8  ;;  %v406_v8 = vld [vmem:[%s841_s4 + $0x8] sm:$0xff] }
 0x10f   : > { %v267_v29 = vpop.f32.mrf.mxu0 }
 0x110   : > { %v268_v31 = vadd.f32 %v267_v29, %v238_v28 }
 0x117   : > { %v298_v34 = vpop.f32.mrf.mxu1  ;;  %v324_v35 = vpop.f32.mrf.mxu2 }
 0x118   : > { %v299_v36 = vadd.f32 %v298_v34, %v268_v31  ;;  %v349_v38 = vpop.f32.mrf.mxu3  ;;  %v376_v41 = vpop.f32.mrf.mxu0 }
 0x11a   : > { %v325_v40 = vadd.f32 %v324_v35, %v299_v36 }
 0x11c   : > { %v350_v42 = vadd.f32 %v349_v38, %v325_v40 }
 0x11e   : > { %v377_v45 = vadd.f32 %v376_v41, %v350_v42 }
 0x11f   : > { %v399_v46 = vpop.f32.mrf.mxu1 }
 0x120   : > { %v400_v47 = vadd.f32 %v399_v46, %v377_v45 }
 0x122   : > { %v402_v50 = vmax.f32 %v400_v47, 0.0 }
 0x124   : > { %v416_v51 = vsel %vm414_vm2, %v402_v50, 0 }
 0x125   : > { %v433_v54 = vand.u32 4294901760, %v416_v51 }
 0x127   : > { %v468_v55 = vsub.f32 %v416_v51, %v433_v54  ;;  %434 = vmatpush.msrb.mxu2 %v433_v54  ;;  %527 = vmatpush.msra.mxu1 %v433_v54 }
 0x128   : > { %440 = vmatmul.f32.vlgmr.msrb.gmra.mxu2 %v439_v52  ;;  %531 = vmatmul.f32.vlgmr.msra.gmra.mxu1 %v437_v43 }
 0x129   : > { %499 = vmatpush.msra.mxu0 %v468_v55  ;;  %v469_v57 = vand.u32 4294901760, %v468_v55 }
 0x12a   : > { %502 = vmatmul.f32.vlgmr.msra.gmra.mxu0 %v436_v37 }
 0x12b   : > { %559 = vmatpush.msra.mxu2 %v469_v57  ;;  %v470_v58 = vsub.f32 %v468_v55, %v469_v57 }
 0x12d   : > { %v471_v60 = vand.u32 4294901760, %v470_v58 }
 0x12f   : > { %472 = vmatpush.msrb.mxu3 %v471_v60 }
 0x130   : > { %474 = vmatmul.f32.vlgmr.msrb.gmra.mxu3 %v435_v32  ;;  %448 = vmatmul.f32.gmra.mxu2 %v447_v59 }
 0x131   : > { %585 = vmatpush.msra.mxu3 %v433_v54  ;;  %537 = vmatmul.f32.gmra.mxu1 %v445_v53 }
 0x132   : > { %507 = vmatmul.f32.gmra.mxu0 %v444_v49 }
 0x138   : > { %478 = vmatmul.f32.gmra.mxu3 %v443_v44  ;;  %561 = vmatmul.f32.vlgmr.msra.gmra.mxu2 %v435_v32 }
 0x140   : > { %587 = vmatmul.f32.vlgmr.msra.gmra.mxu3 %v435_v32  ;;  %565 = vmatmul.f32.gmra.mxu2 %v443_v44 }
 0x148   : > { %591 = vmatmul.f32.gmra.mxu3 %v443_v44 }
 0x1a5   : > { %v532_v11 = vpop.f32.mrf.mxu1 }
 0x1a7   : > { %v503_v6 = vpop.f32.mrf.mxu0 }
 0x1ab   : > { %v441_v61 = vpop.f32.mrf.mxu2 }
 0x1ac   : > { %v442_v5 = vadd.f32 %v441_v61, %v405_v62 }
 0x1ae   : > { %v538_v22 = vpop.f32.mrf.mxu1 }
 0x1af   : > { %v508_v17 = vpop.f32.mrf.mxu0 }
 0x1b3   : > { %v475_v63 = vpop.f32.mrf.mxu3  ;;  %v449_v2 = vpop.f32.mrf.mxu2 }
 0x1b4   : > { %v476_v7 = vadd.f32 %v475_v63, %v442_v5  ;;  %v450_v12 = vadd.f32 %v449_v2, %v406_v8 }
 0x1b6   : > { %v504_v13 = vadd.f32 %v503_v6, %v476_v7 }
 0x1b8   : > { %v533_v16 = vadd.f32 %v532_v11, %v504_v13 }
 0x1bb   : > { %v479_v10 = vpop.f32.mrf.mxu3  ;;  %v562_v14 = vpop.f32.mrf.mxu2 }
 0x1bc   : > { %v480_v15 = vadd.f32 %v479_v10, %v450_v12  ;;  %v563_v18 = vadd.f32 %v562_v14, %v533_v16 }
 0x1be   : > { %v509_v21 = vadd.f32 %v508_v17, %v480_v15 }
 0x1c0   : > { %v539_v25 = vadd.f32 %v538_v22, %v509_v21 }
 0x1c3   : > { %v588_v19 = vpop.f32.mrf.mxu3  ;;  %v566_v24 = vpop.f32.mrf.mxu2 }
 0x1c4   : > { %v589_v20 = vadd.f32 %v588_v19, %v563_v18  ;;  %v567_v26 = vadd.f32 %v566_v24, %v539_v25 }
 0x1c6   : > { %v715_v23 = vmul.f32 -1.442695, %v589_v20 }
 0x1c8   : > { %732 = vpow2.f32 %v715_v23 }
 0x1cb   : > { %v592_v27 = vpop.f32.mrf.mxu3 }
 0x1cc   : > { %v593_v28 = vadd.f32 %v592_v27, %v567_v26 }
 0x1ce   : > { %v733_v29 = vpop.eup %732  ;;  %v716_v30 = vmul.f32 -1.442695, %v593_v28 }
 0x1cf   : > { %v601_v31 = vadd.f32 1.0, %v733_v29 }
 0x1d0   : > { %734 = vpow2.f32 %v716_v30 }
 0x1d1   : > { %736 = vrcp.f32 %v601_v31  ;;  %v614_v37 = vand.u32 2147483648, %v601_v31  ;;  %v612_v39 = vand.u32 2147483647, %v601_v31  ;;  %vm608_vm4 = vweird.f32 %v601_v31 }
 0x1d3   : > { %v615_v42 = vor.u32 1.1754944e-38, %v614_v37  ;;  %vm613_vm6 = vcmp.eq.f32.partialorder %v612_v39, 8.507059e+37 }
 0x1d6   : > { %v735_v32 = vpop.eup %734 }
 0x1d7   : > { %v737_v33 = vpop.eup %736  ;;  %v602_v34 = vadd.f32 1.0, %v735_v32 }
 0x1d8   : > { %v604_v35 = vmul.f32 %v737_v33, %v601_v31  ;;  %vm609_vm3 = vweird.f32 %v737_v33 }
 0x1d9   : > { %738 = vrcp.f32 %v602_v34  ;;  %vm610_vm5 = vmor %vm608_vm4, %vm609_vm3  ;;  %v629_v47 = vand.u32 2147483648, %v602_v34  ;;  %v627_v49 = vand.u32 2147483647, %v602_v34  ;;  %vm623_vm8 = vweird.f32 %v602_v34 }
 0x1da   : > { %v605_v36 = vsub.f32 1.0, %v604_v35 }
 0x1db   : > { %v630_v51 = vor.u32 1.1754944e-38, %v629_v47  ;;  %vm628_vm10 = vcmp.eq.f32.partialorder %v627_v49, 8.507059e+37 }
 0x1dc   : > { %v606_v38 = vmul.f32 %v737_v33, %v605_v36 }
 0x1de   : > { %v607_v40 = vadd.f32 %v737_v33, %v606_v38 }
 0x1df   : > { %v739_v41 = vpop.eup %738 }
 0x1e0   : > { %v611_v43 = vsel %vm610_vm5, %v737_v33, %v607_v40  ;;  %v619_v44 = vmul.f32 %v739_v41, %v602_v34  ;;  %vm624_vm7 = vweird.f32 %v739_v41 }
 0x1e1   : > { %v616_v45 = vsel %vm613_vm6, %v615_v42, %v611_v43  ;;  %vm625_vm9 = vmor %vm623_vm8, %vm624_vm7 }
 0x1e2   : > { %635 = vperm.xlu1 %730, %v616_v45   ;;  %v620_v46 = vsub.f32 1.0, %v619_v44 }
 0x1e4   : > { %v621_v48 = vmul.f32 %v739_v41, %v620_v46 }
 0x1e6   : > { %v622_v50 = vadd.f32 %v739_v41, %v621_v48 }
 0x1e8   : > { %v626_v52 = vsel %vm625_vm9, %v739_v41, %v622_v50 }
 0x1e9   : > { %v631_v53 = vsel %vm628_vm10, %v630_v51, %v626_v52 }
 0x1ea   : > { %640 = vperm.xlu1 %730, %v631_v53  }
 0x254   : > { %v636_v54 = vpop.permute.xlu1 %635 }
 0x255   : > { %v643_v55 = vmul.f32 %v636_v54, %v801_v3  ;;  %v644_v56 = vmul.f32 %v636_v54, %v803_v4 }
 0x257   : > { %647 = vst [vmem:[%s224_s13] sm:$0xff] %v643_v55 }
 0x258   : > { %648 = vst [vmem:[%s224_s13 + $0x8] sm:$0xff] %v644_v56 }
 0x25c   : > { %v641_v57 = vpop.permute.xlu1 %640 }
 0x25d   : > { %v645_v58 = vmul.f32 %v641_v57, %v795_v0  ;;  %v646_v59 = vmul.f32 %v641_v57, %v797_v1 }
 0x25f   : > { %649 = vst [vmem:[%s224_s13 + $0x10] sm:$0xff] %v645_v58 }
 0x260   : > { %650 = vst [vmem:[%s224_s13 + $0x18] sm:$0xff] %v646_v59 }
 0x261 PF: > { %s15_s18 = sadd.s32 1, %s746_s18  }
 0x262   : > { %p12_p4 = scmp.ge.s32.totalorder %s15_s18, 4  }
 0x264   :  { %14 = sbr.rel (!%p12_p4) target bundleno = 1 (0x1), region = 70 }

</bundles_post_ra>
